<compile_context>
chip_gen: v7x
topology: tpu7x:2x2x1
jax: 0.10.0
libtpu: 0.0.40
codegen_flags: <defaults>
</compile_context>

<pallas_src>
import functools

import jax
import jax.numpy as jnp
from jax.experimental import pallas as pl
from jax.experimental.pallas import tpu as pltpu


def _linear_head_kernel(x_ref, w_ref, b_ref, o_ref):
    # x_ref: (tm, D_in)          (f32 or bf16; cast below is a no-op for bf16)
    # w_ref: (D_in, tn)  bf16    (pre-transposed once at param-prep time)
    # b_ref: (1, tn)     f32
    # o_ref: (tm, tn)    f32
    x = x_ref[...].astype(jnp.bfloat16)
    acc = jnp.dot(x, w_ref[...], preferred_element_type=jnp.float32)
    o_ref[...] = (acc + b_ref[...].astype(jnp.float32)).astype(o_ref.dtype)


def prepare_linear_head_params(weight, bias, weight_dtype=jnp.bfloat16):
    """One-time prep (do this at parameter-load time, not per forward call).

    weight: (D_out, D_in) PyTorch layout -> returns (D_in, D_out) in bf16.
    bias:   (D_out,)                     -> returns (1, D_out) in f32.
    """
    w_t = jnp.asarray(weight).T.astype(weight_dtype)
    b2 = jnp.asarray(bias).reshape(1, -1).astype(jnp.float32)
    return w_t, b2


def _vmem_capacity_bytes():
    try:
        cap = getattr(pltpu.get_tpu_info(), "vmem_capacity_bytes", None)
        if cap:
            return int(cap)
    except Exception:
        pass
    return 64 << 20  # conservative fallback (v7x per-TC physical VMEM)


def _pick_tiles(B, D_in, D_out, vmem_cap):
    # Row tile: as large as possible (<= 512) to amortize per-step overhead.
    tm = B if B <= 512 else 512  # 512 % 8 == 0; cdiv grid handles a ragged tail.

    # Column tile: biggest 128-multiple (or full D_out) whose double-buffered
    # working set (bf16 weight slab + x tile + f32 out tile + bias) fits in a
    # fraction of the *actual* per-core VMEM.
    budget = int(0.45 * vmem_cap)

    def working_set(tn_):
        return (2 * 2 * D_in * tn_       # bf16 weight slab, double-buffered
                + 2 * 4 * tm * D_in      # x tile (f32 worst case), double-buffered
                + 2 * 4 * tm * tn_       # f32 out tile, double-buffered
                + 2 * 4 * tn_)           # bias slice

    candidates = [D_out] + [c for c in (4096, 2048, 1024, 512, 256, 128)
                            if c < D_out]
    tn = candidates[-1]
    for c in candidates:
        if working_set(c) <= budget:
            tn = c
            break

    # v7x megacore: avoid a (1,1) grid so both TensorCores get a step, but only
    # if the halved tile stays (8,128)-aligned.
    if pl.cdiv(B, tm) * pl.cdiv(D_out, tn) == 1:
        if tn % 256 == 0:
            tn //= 2
        elif tm % 16 == 0:
            tm //= 2
    return tm, tn


def linear_head(x, w_t, b2, *, tm=None, tn=None):
    """y = x @ W.T + b with pre-prepared params.

    x:   (B, D_in)       f32 or bf16
    w_t: (D_in, D_out)   bf16 (from prepare_linear_head_params)
    b2:  (1, D_out)      f32
    """
    B, D_in = x.shape
    D_in_w, D_out = w_t.shape
    assert D_in_w == D_in and b2.shape == (1, D_out)

    vmem_cap = _vmem_capacity_bytes()
    auto_tm, auto_tn = _pick_tiles(B, D_in, D_out, vmem_cap)
    tm = auto_tm if tm is None else tm
    tn = auto_tn if tn is None else tn

    n_i = pl.cdiv(B, tm)        # row tiles
    n_j = pl.cdiv(D_out, tn)    # output-column tiles

    # Loop-order selection: hold the operand whose re-streaming would cost the
    # most HBM bytes. weight-stationary (j outer, i inner): W once + x * n_j.
    # x-stationary (i outer, j inner): x once + W * n_i.
    w_bytes = D_in * D_out * jnp.dtype(w_t.dtype).itemsize
    x_bytes = B * D_in * jnp.dtype(x.dtype).itemsize
    weight_stationary = (w_bytes + n_j * x_bytes) <= (x_bytes + n_i * w_bytes)

    if weight_stationary:
        grid = (n_j, n_i)
        x_map = lambda j, i: (i, 0)
        w_map = lambda j, i: (0, j)   # constant across inner axis -> slab held
        b_map = lambda j, i: (0, j)
        o_map = lambda j, i: (i, j)
    else:
        grid = (n_i, n_j)
        x_map = lambda i, j: (i, 0)   # constant across inner axis -> x held
        w_map = lambda i, j: (0, j)
        b_map = lambda i, j: (0, j)
        o_map = lambda i, j: (i, j)

    # Scoped-VMEM budget from the actual tiles (double-buffered), with headroom,
    # never exceeding ~90% of this generation's physical VMEM.
    x_item = jnp.dtype(x.dtype).itemsize
    ws = (2 * 2 * D_in * tn + 2 * x_item * tm * D_in
          + 2 * 4 * tm * tn + 2 * 4 * tn)
    vmem_limit = int(min(max(int(1.5 * ws), 32 << 20), int(0.9 * vmem_cap)))

    return pl.pallas_call(
        _linear_head_kernel,
        out_shape=jax.ShapeDtypeStruct((B, D_out), jnp.float32),
        grid_spec=pltpu.PrefetchScalarGridSpec(
            num_scalar_prefetch=0,
            grid=grid,
            in_specs=[
                pl.BlockSpec((tm, D_in), x_map),   # activation row tile
                pl.BlockSpec((D_in, tn), w_map),   # pre-transposed bf16 weight slab
                pl.BlockSpec((1, tn), b_map),      # bias slice
            ],
            out_specs=pl.BlockSpec((tm, tn), o_map),
        ),
        compiler_params=pltpu.CompilerParams(
            dimension_semantics=("parallel", "parallel"),
            vmem_limit_bytes=vmem_limit,
        ),
    )(x, w_t, b2)


def linear_head_torch_layout(x, weight, bias):
    """Convenience wrapper taking PyTorch-layout (out,in) f32 params."""
    w_t, b2 = prepare_linear_head_params(weight, bias)
    return linear_head(x, w_t, b2)


if __name__ == "__main__":
    # Small, TPU-friendly shapes consistent with LinearHead: batch=8, embed_dim=128.
    B, D = 8, 128
    key = jax.random.PRNGKey(0)
    kx, kw, kb = jax.random.split(key, 3)

    bound = 1.0 / (D ** 0.5)
    x = jax.random.normal(kx, (B, D), dtype=jnp.float32)
    weight = jax.random.uniform(kw, (D, D), minval=-bound, maxval=bound,
                                dtype=jnp.float32)   # (out_features, in_features)
    bias = jax.random.uniform(kb, (D,), minval=-bound, maxval=bound,
                              dtype=jnp.float32)

    # One-time parameter prep (transpose + bf16 cast), then the kernel call.
    w_t, b2 = prepare_linear_head_params(weight, bias)
    y = jax.block_until_ready(linear_head(x, w_t, b2))

    # Reference: same math as PyTorch nn.Linear (f32). bf16 MXU inputs with f32
    # accumulation give ~1e-3 relative error; tolerance reflects that.
    y_ref = x @ weight.T + bias
    assert y.shape == (B, D)
    assert jnp.allclose(y, y_ref, atol=2e-2, rtol=2e-2), "mismatch vs reference"

    print("KERNEL_OK")
</pallas_src>

<mosaic_0001>
module attributes {stable_mosaic.version = 11 : i64} {
  func.func @_linear_head_kernel(%arg0: i32, %arg1: i32, %arg2: memref<8x128xf32, #tpu.memory_space<vmem>>, %arg3: memref<128x128xbf16, #tpu.memory_space<vmem>>, %arg4: memref<1x128xf32, #tpu.memory_space<vmem>>, %arg5: memref<8x128xf32, #tpu.memory_space<vmem>>) attributes {dimension_semantics = [#tpu.dimension_semantics<parallel>, #tpu.dimension_semantics<parallel>], iteration_bounds = array<i64: 1, 1>, scalar_prefetch = 0 : i64, scratch_operands = 0 : i64, tpu.core_type = #tpu.core_type<tc>, window_params = [{transform_indices = @transform_0, window_bounds = array<i64: 8, 128>}, {transform_indices = @transform_1, window_bounds = array<i64: 128, 128>}, {transform_indices = @transform_2, window_bounds = array<i64: 1, 128>}, {transform_indices = @transform_3, window_bounds = array<i64: 8, 128>}]} {
    %c0 = arith.constant 0 : index
    %c0_0 = arith.constant 0 : index
    %0 = vector.load %arg2[%c0, %c0_0] : memref<8x128xf32, #tpu.memory_space<vmem>>, vector<8x128xf32>
    %1 = arith.truncf %0 : vector<8x128xf32> to vector<8x128xbf16>
    %c0_1 = arith.constant 0 : index
    %c0_2 = arith.constant 0 : index
    %2 = vector.load %arg3[%c0_1, %c0_2] : memref<128x128xbf16, #tpu.memory_space<vmem>>, vector<128x128xbf16>
    %cst = arith.constant dense<0.000000e+00> : vector<8x128xf32>
    %3 = tpu.matmul %1, %2, %cst {dimension_numbers = #tpu.dot_dimension_numbers<[1], [0], [0], [1], [0, 0, 1, 1], [], []>} : vector<8x128xbf16>, vector<128x128xbf16>, vector<8x128xf32> -> vector<8x128xf32>
    %c0_3 = arith.constant 0 : index
    %c0_4 = arith.constant 0 : index
    %4 = vector.load %arg4[%c0_3, %c0_4] : memref<1x128xf32, #tpu.memory_space<vmem>>, vector<1x128xf32>
    %5 = vector.broadcast %4 : vector<1x128xf32> to vector<8x128xf32>
    %6 = arith.addf %3, %5 : vector<8x128xf32>
    %c0_5 = arith.constant 0 : index
    %c0_6 = arith.constant 0 : index
    %7 = vector.load %arg5[%c0_5, %c0_6] : memref<8x128xf32, #tpu.memory_space<vmem>>, vector<8x128xf32>
    tpu.vector_store %arg5[%c0_5, %c0_6], %6 {strides = array<i32>} : memref<8x128xf32, #tpu.memory_space<vmem>>, vector<8x128xf32>,
    return
  }
  func.func @transform_0(%arg0: i32, %arg1: i32) -> (i32, i32) {
    %c0_i32 = arith.constant 0 : i32
    %c0_i32_0 = arith.constant 0 : i32
    return %arg1, %c0_i32 : i32, i32
  }
  func.func @transform_1(%arg0: i32, %arg1: i32) -> (i32, i32) {
    %c0_i32 = arith.constant 0 : i32
    %c0_i32_0 = arith.constant 0 : i32
    return %c0_i32, %arg0 : i32, i32
  }
  func.func @transform_2(%arg0: i32, %arg1: i32) -> (i32, i32) {
    %c0_i32 = arith.constant 0 : i32
    %c0_i32_0 = arith.constant 0 : i32
    return %c0_i32, %arg0 : i32, i32
  }
  func.func @transform_3(%arg0: i32, %arg1: i32) -> (i32, i32) {
    %c0_i32 = arith.constant 0 : i32
    return %arg1, %arg0 : i32, i32
  }
}

</mosaic_0001>

<bundles_post_ra>
// kernel: tpu_custom_call.1
= control target key start
LH: loop header
LB: loop body
LE: loop exit
PB: predicated region body
PF: predicated region fallthrough
CT: control target
= control target key end

     0   :  { %8 = vsyncpa [#allocation3], 0  ;;  %s370_s0 = inlined_call_operand.hbm [shape: f32[8,128], index: 0, kind: input, shape index: {}]   ;;  %s371_s1 = inlined_call_operand.hbm [shape: bf16[128,128], index: 1, kind: input, shape index: {}]   ;;  %s372_s2 = inlined_call_operand.vmem [shape: f32[1,128], index: 2, kind: input, shape index: {}]   ;;  %s373_s3 = inlined_call_operand.hbm [shape: f32[8,128], index: 3, kind: output, shape index: {}]  }
   0x1   :  { %9 = vsyncpa [#allocation6], 0 }
   0x2   :  { %10 = vsyncpa [#allocation4], 0  ;;  %s297_s12 = smov [#allocation2]   ;;  %s298_s14 = smov [#allocation5]  }
   0x3   :  { %s17_s13 = sshll.u32 %s297_s12, 4  ;;  %s26_s15 = sshll.u32 %s298_s14, 4  ;;  %s18_s13 = int_to_ptr.vmem [resolvable:$true] %s17_s13  ;;  %s324_s15 = int_to_ptr.vmem [resolvable:$true] %s26_s15 }
   0x4   :  { %s225_s18 = scalar_lea.hbm %s370_s0, 128 }
   0x5   :  { %p226_p0 = scmp.ne.s32.totalorder %s370_s0, %s225_s18  ;;  %p229_p1 = scmp.lt.u32.totalorder %s225_s18, %s370_s0 }
   0x7   :  { %p231_p2 = pnand %p229_p1, %p226_p0 }
   0x9   :  { %234 = shalt.err (!%p231_p2)
}
   0xa   :  { %s235_s23 = scalar_lea.vmem %s18_s13, 128  ;;  %p240_p4 = scmp.lt.s32.totalorder %s18_s13, %s18_s13 }
   0xb   :  { %p236_p3 = scmp.ne.s32.totalorder %s18_s13, %s235_s23  ;;  %p241_p5 = scmp.lt.s32.totalorder %s235_s23, %s235_s23 }
   0xd   :  { %p242_p6 = por %p241_p5, %p240_p4 }
   0xf   :  { %p243_p7 = pnand %p242_p6, %p236_p3 }
  0x11   :  { %246 = shalt.err (!%p243_p7)
}
  0x12   :  { %20 = dma.hbm_to_vmem [thread:$0]  %s370_s0, 128, %s18_s13, [#allocation3]  }
  0x13   :  { %s247_s28 = scalar_lea.hbm %s371_s1, 1024 }
  0x14   :  { %p248_p8 = scmp.ne.s32.totalorder %s371_s1, %s247_s28  ;;  %p251_p9 = scmp.lt.u32.totalorder %s247_s28, %s371_s1 }
  0x16   :  { %p253_p10 = pnand %p251_p9, %p248_p8 }
  0x18   :  { %256 = shalt.err (!%p253_p10)
}
  0x19   :  { %s257_s6 = scalar_lea.vmem %s324_s15, 1024  ;;  %p262_p12 = scmp.lt.s32.totalorder %s324_s15, %s324_s15 }
  0x1a   :  { %p258_p11 = scmp.ne.s32.totalorder %s324_s15, %s257_s6  ;;  %p263_p13 = scmp.lt.s32.totalorder %s257_s6, %s257_s6 }
  0x1c   :  { %p264_p0 = por %p263_p13, %p262_p12 }
  0x1e   :  { %p265_p1 = pnand %p264_p0, %p258_p11 }
  0x20   :  { %268 = shalt.err (!%p265_p1)
}
  0x21   :  { %s299_s0 = smov 64   ;;  %s300_s7 = smov 4  }
  0x22   :  { %32 = dma.hbm_to_vmem [thread:$0]  %s371_s1, 1024, %s324_s15, [#allocation6], %s299_s0, %s299_s0, %s300_s7  }
  0x23   :  { %291 = dma.done.wait [#allocation3], 128  }
  0x24   :  { %292 = vsyncadd [#allocation3], 4294967168 }
  0x25   :  { %293 = dma.done.wait [#allocation6], 1024  }
  0x26   :  { %294 = vsyncadd [#allocation6], 4294966272  ;;  %v301_v0 = vmov 0.0   ;;  %vm302_vm0 = vmmov 0   ;;  %v217_v1 = vld [vmem:[#allocation5] sm:$0xff]   ;;  %v218_v2 = vld [vmem:[#allocation5 + $0x8] sm:$0xff]  }
  0x27   :  { %190 = vmatprep.subr.bf16.mxu0 %v301_v0  ;;  %206 = vmatprep.mubr.msk.bf16.mxu0 %vm302_vm0, %v301_v0  ;;  %v219_v3 = vld [vmem:[#allocation5 + $0x10] sm:$0xff]   ;;  %v220_v4 = vld [vmem:[#allocation5 + $0x18] sm:$0xff]   ;;  %v221_v5 = vld [vmem:[#allocation5 + $0x20] sm:$0xff]   ;;  %s303_s11 = smov [#allocation7]  }
  0x28   :  { %191 = vmatpush3.bf16.msra.mxu0 %v217_v1  ;;  %v222_v6 = vld [vmem:[#allocation5 + $0x28] sm:$0xff]   ;;  %v223_v7 = vld [vmem:[#allocation5 + $0x30] sm:$0xff]   ;;  %v224_v8 = vld [vmem:[#allocation5 + $0x38] sm:$0xff]   ;;  %s162_s12 = sshll.u32 %s303_s11, 4  ;;  %s163_s12 = int_to_ptr.vmem [resolvable:$true] %s162_s12 }
  0x29   :  { %192 = vmatprep.subr.bf16.mxu0 %v301_v0  ;;  %v42_v9 = vld [vmem:[#allocation2] sm:$0xff]  ;;  %s269_s13 = scalar_lea.vmem %s163_s12, 128  ;;  %p274_p3 = scmp.lt.s32.totalorder %s163_s12, %s163_s12 }
  0x2a   :  { %v43_v10 = vpack.c.bf16 %v42_v9, %v42_v9  ;;  %v172_v11 = vld [vmem:[%s372_s2] ss:$0 sm:$0xff]  ;;  %p270_p2 = scmp.ne.s32.totalorder %s163_s12, %s269_s13  ;;  %p275_p4 = scmp.lt.s32.totalorder %s269_s13, %s269_s13 }
  0x2c   :  { %193 = vmatpush3.bf16.msra.mxu0 %v218_v2  ;;  %p276_p5 = por %p275_p4, %p274_p3 }
  0x2d   :  { %194 = vmatprep.subr.bf16.mxu0 %v301_v0 }
  0x2e   :  { %p277_p6 = pnand %p276_p5, %p270_p2 }
  0x30   :  { %195 = vmatpush3.bf16.msra.mxu0 %v219_v3 }
  0x31   :  { %196 = vmatprep.subr.bf16.mxu0 %v301_v0 }
  0x34   :  { %197 = vmatpush3.bf16.msra.mxu0 %v220_v4 }
  0x35   :  { %198 = vmatprep.subr.bf16.mxu0 %v301_v0 }
  0x38   :  { %199 = vmatpush3.bf16.msra.mxu0 %v221_v5 }
  0x39   :  { %200 = vmatprep.subr.bf16.mxu0 %v301_v0 }
  0x3c   :  { %201 = vmatpush3.bf16.msra.mxu0 %v222_v6 }
  0x3d   :  { %202 = vmatprep.subr.bf16.mxu0 %v301_v0 }
  0x40   :  { %203 = vmatpush3.bf16.msra.mxu0 %v223_v7 }
  0x41   :  { %204 = vmatprep.subr.bf16.mxu0 %v301_v0 }
  0x44   :  { %205 = vmatpush3.bf16.msra.mxu0 %v224_v8 }
  0x47   :  { %207 = vmatmul.mubr.bf16.vlgmr.msra.gmra.mrb[0].mxu0 %v43_v10 }
 0x11a   :  { %v149_v12 = vpop.f32.mrb[0].mxu0 }
 0x11b   :  { %v150_v13 = vadd.f32 %v172_v11, %v149_v12  ;;  %v208_v14 = vpop.f32.mrb[1].mxu0 }
 0x11c   :  { %v152_v15 = vpop.f32.mrb[2].mxu0 }
 0x11d   :  { %155 = vst [vmem:[#allocation7] sm:$0xff] %v150_v13  ;;  %v209_v16 = vpop.f32.mrb[3].mxu0 }
 0x11e   :  { %280 = shalt.err (!%p277_p6)
}
 0x11f   :  { %s281_s2 = scalar_lea.hbm %s373_s3, 128 }
 0x120   :  { %p282_p7 = scmp.ne.s32.totalorder %s373_s3, %s281_s2  ;;  %p285_p8 = scmp.lt.u32.totalorder %s281_s2, %s373_s3 }
 0x122   :  { %p287_p9 = pnand %p285_p8, %p282_p7 }
 0x124   :  { %290 = shalt.err (!%p287_p9)
}
 0x125   :  { %165 = dma.vmem_to_hbm [thread:$0]  %s163_s12, 128, %s373_s3, [#allocation4]  }
 0x126   :  { %295 = dma.done.wait [#allocation4], 128  }
 0x127   :  { %296 = vsyncadd [#allocation4], 4294967168 }
 0x128   :  { %169 = vsyncpa [#allocation3], 1 }
 0x129   :  { %170 = vsyncpa [#allocation6], 1 }
 0x12a   :  { %171 = vsyncpa [#allocation4], 1 }

</bundles_post_ra>
